<compile_context>
chip_gen: v5e
topology: v5e:2x2
jax: 0.10.0
libtpu: 0.0.40
codegen_flags: <defaults>
</compile_context>

<pallas_src>
import math
from functools import partial

import jax
import jax.numpy as jnp
from jax import lax
from jax.experimental import pallas as pl
from jax.experimental.pallas import tpu as pltpu


def get_pad(in_, ksize, stride, atrous=1):
    out_ = math.ceil(float(in_) / stride)
    return int(((out_ - 1) * stride + atrous * (ksize - 1) + 1 - in_) / 2)


def _gauss_1d(kernel_size, sigma):
    """Normalized 1-D Gaussian taps as Python floats (separable factorization
    of the module's normalized 2-D Gaussian; normalization cancels the
    constant prefactor)."""
    half = kernel_size // 2
    g = [math.exp(-0.5 * (i - half) ** 2 / float(sigma) ** 2)
         for i in range(kernel_size)]
    s = sum(g)
    return tuple(v / s for v in g)


def _band_matrix(n_in, n_out, K, pad, taps):
    """Banded Toeplitz matrix M (n_in, n_out) with zero padding baked in:
      out[..., j] = sum_a in[..., a] * M[a, j],  M[a, j] = taps[a - j + pad]
    which equals cross-correlation of the zero-padded input with `taps`."""
    a = jnp.arange(n_in)[:, None]
    j = jnp.arange(n_out)[None, :]
    k = a - j + pad
    tap = jnp.asarray(taps, jnp.float32)
    return jnp.where((k >= 0) & (k < K), tap[jnp.clip(k, 0, K - 1)], 0.0)


def _choose_tiling(N, C, H, W, Hout, Wout, in_itemsize):
    """Pick (NB images per step, HB rows per step) under a VMEM budget."""
    budget = 32 * 1024 * 1024          # per-step working set; v7x-safe

    # --- batch block: amortize per-step overhead for small images ----------
    img_bytes = C * H * W * in_itemsize
    nb_cap = max(1, (2 * 1024 * 1024) // max(img_bytes, 1))
    if N >= 2:
        nb_cap = min(nb_cap, N // 2)   # keep >= 2 "parallel" steps (megacore)
    NB = 1
    for d in range(1, N + 1):
        if N % d == 0 and d <= nb_cap:
            NB = d

    def step_bytes(hb):
        inputs = 2 * 2 * NB * C * hb * W * in_itemsize       # pred+targ, 2 bufs
        toep = 2 * 2 * (W * Wout + hb * Hout) * 4            # 4 Toeplitz mats
        acc = 2 * NB * Hout * Wout * 4                       # conv-out scratch
        interm = NB * (hb * W + 2 * hb * Wout + 2 * Hout * Wout) * 4
        return inputs + toep + acc + interm

    # --- row block: cap per-step VMEM (v7x has only 64 MiB physical) -------
    HB = H
    if step_bytes(H) > budget:
        best = None
        d = (H // 8) * 8
        while d >= 8:
            if d < H and H % d == 0:
                best = d
                if step_bytes(d) <= budget:
                    break
            d -= 8
        if best is not None:          # else: best effort, keep HB = H
            HB = best
    return NB, HB, step_bytes(HB)


def _l1_freq_kernel(pred_ref, targ_ref, twg_ref, twb_ref, thg_ref, thb_ref,
                    coarse_out, fine_out, acc_c, acc_b, *, NB, C):
    """One (batch-block, row-block) tile per grid step.

    pred_ref/targ_ref : (NB, C, HB, W) input blocks (any float dtype).
    twg/twb           : (W, Wout)  Gaussian / box W-pass Toeplitz (full).
    thg/thb           : (HB, Hout) H-pass Toeplitz, transposed layout, this
                        row block's columns.
    coarse_out/fine_out : (1, 1, 128) lane-dense partial |.|-sum tiles,
                          written once per batch block (at the last row step).
    acc_c/acc_b       : (NB, Hout, Wout) f32 conv-output accumulators.
    """
    r = pl.program_id(1)

    @pl.when(r == 0)
    def _():
        acc_c[...] = jnp.zeros_like(acc_c)
        acc_b[...] = jnp.zeros_like(acc_b)

    twg = twg_ref[...]
    twb = twb_ref[...]
    thg = thg_ref[...]
    thb = thb_ref[...]

    # Contract the sublane (row) axis of both operands: result = A.T @ B.
    dn = (((0,), (0,)), ((), ()))

    for n in range(NB):
        # Channel-summed pred-target difference for this image / row block,
        # accumulated per channel in f32 (no full upcast copies).
        ds = (pred_ref[n, 0].astype(jnp.float32)
              - targ_ref[n, 0].astype(jnp.float32))
        for c in range(1, C):
            ds = ds + (pred_ref[n, c].astype(jnp.float32)
                       - targ_ref[n, c].astype(jnp.float32))

        # Separable filters as MXU matmuls (padding baked into the bands).
        low_w = jnp.dot(ds, twg, preferred_element_type=jnp.float32)  # (HB, Wout)
        box_w = jnp.dot(ds, twb, preferred_element_type=jnp.float32)
        acc_c[n] += lax.dot_general(thg, low_w, dn,
                                    preferred_element_type=jnp.float32)
        acc_b[n] += lax.dot_general(thb, box_w, dn,
                                    preferred_element_type=jnp.float32)

    @pl.when(r == pl.num_programs(1) - 1)
    def _():
        coarse = acc_c[...]                 # Gaussian conv of (pred - target)
        fine = acc_b[...] - coarse          # high_pass = ones - low_pass
        ones = jnp.ones((1, 1, 128), jnp.float32)
        coarse_out[...] = jnp.sum(jnp.abs(coarse)) * ones
        fine_out[...] = jnp.sum(jnp.abs(fine)) * ones


class L1FrequencyLossPallas:
    def __init__(self, in_nc, kernel_size, sigma):
        self.in_nc = in_nc
        self.kernel_size = kernel_size
        self.sigma = sigma
        self.g1 = _gauss_1d(kernel_size, sigma)              # Python floats
        g = jnp.asarray(self.g1, dtype=jnp.float32)
        g2 = g[:, None] * g[None, :]                         # (K, K), sums to 1
        # (1, C, K, K) low-pass identical to the PyTorch buffer (used only by
        # the pure-JAX reference check).
        self.low_w = jnp.tile(g2[None, None], (1, in_nc, 1, 1))

    def __call__(self, predicted, target):
        N, C, H, W = predicted.shape
        K = self.kernel_size
        pad = get_pad(H, K, 1)      # PyTorch module derives pad from H only
        Hout = H + 2 * pad - K + 1
        Wout = W + 2 * pad - K + 1

        box_taps = (1.0,) * K
        twg = _band_matrix(W, Wout, K, pad, self.g1)   # (W, Wout)
        twb = _band_matrix(W, Wout, K, pad, box_taps)
        thg = _band_matrix(H, Hout, K, pad, self.g1)   # (H, Hout) == Th.T
        thb = _band_matrix(H, Hout, K, pad, box_taps)

        in_itemsize = predicted.dtype.itemsize
        NB, HB, step_bytes = _choose_tiling(N, C, H, W, Hout, Wout, in_itemsize)
        n_blocks = N // NB
        R = H // HB

        # TODO(synk): when N == 1 on v7x, add a second "parallel" split (e.g.
        # over Wout column blocks) so the second TensorCore is not idle.
        # TODO(synk): at very large W (>~2k) the dense banded-Toeplitz W pass
        # starts to waste MXU FLOPs; switch that pass back to K-tap
        # shift-accumulate (or a blocked band) there.

        kern = partial(_l1_freq_kernel, NB=NB, C=C)
        vmem_limit = int(min(max(int(step_bytes * 1.25) + (8 << 20), 32 << 20),
                             48 << 20))

        coarse_part, fine_part = pl.pallas_call(
            kern,
            out_shape=(jax.ShapeDtypeStruct((n_blocks, 1, 128), jnp.float32),
                       jax.ShapeDtypeStruct((n_blocks, 1, 128), jnp.float32)),
            grid_spec=pltpu.PrefetchScalarGridSpec(
                num_scalar_prefetch=0,
                grid=(n_blocks, R),
                in_specs=[
                    pl.BlockSpec((NB, C, HB, W), lambda b, r: (b, 0, r, 0)),
                    pl.BlockSpec((NB, C, HB, W), lambda b, r: (b, 0, r, 0)),
                    pl.BlockSpec((W, Wout), lambda b, r: (0, 0)),
                    pl.BlockSpec((W, Wout), lambda b, r: (0, 0)),
                    pl.BlockSpec((HB, Hout), lambda b, r: (r, 0)),
                    pl.BlockSpec((HB, Hout), lambda b, r: (r, 0)),
                ],
                out_specs=(
                    pl.BlockSpec((1, 1, 128), lambda b, r: (b, 0, 0)),
                    pl.BlockSpec((1, 1, 128), lambda b, r: (b, 0, 0)),
                ),
                scratch_shapes=[
                    pltpu.VMEM((NB, Hout, Wout), jnp.float32),
                    pltpu.VMEM((NB, Hout, Wout), jnp.float32),
                ],
            ),
            compiler_params=pltpu.CompilerParams(
                dimension_semantics=("parallel", "arbitrary"),
                vmem_limit_bytes=vmem_limit),
        )(predicted, target, twg, twb, thg, thb)

        # L1Loss(mean) over the conv output (N, 1, Hout, Wout).
        denom = float(N * Hout * Wout)
        l1_coarse = jnp.sum(coarse_part[:, 0, 0]) / denom
        l1_fine = jnp.sum(fine_part[:, 0, 0]) / denom
        return l1_coarse, l1_fine


def _reference(predicted, target, low_w, pad):
    # Plain-JAX reference mirroring F.conv2d / nn.L1Loss(reduction='mean').
    high_w = jnp.ones_like(low_w) - low_w
    dn = ("NCHW", "OIHW", "NCHW")
    conv = lambda x, w: jax.lax.conv_general_dilated(
        x, w, (1, 1), [(pad, pad), (pad, pad)], dimension_numbers=dn)
    l1 = lambda a, b: jnp.mean(jnp.abs(a - b))
    return (l1(conv(predicted, low_w), conv(target, low_w)),
            l1(conv(predicted, high_w), conv(target, high_w)))


if __name__ == "__main__":
    in_nc, kernel_size, sigma = 4, 5, 1.5
    N, H, W = 2, 16, 16

    key = jax.random.PRNGKey(0)
    k1, k2 = jax.random.split(key)
    predicted = jax.random.normal(k1, (N, in_nc, H, W), dtype=jnp.float32)
    target = jax.random.normal(k2, (N, in_nc, H, W), dtype=jnp.float32)

    loss = L1FrequencyLossPallas(in_nc, kernel_size, sigma)
    pad = get_pad(H, kernel_size, 1)

    # --- f32 path, checked against a pure-JAX conv reference ---------------
    l1_coarse, l1_fine = loss(predicted, target)
    jax.block_until_ready((l1_coarse, l1_fine))
    ref_c, ref_f = _reference(predicted, target, loss.low_w, pad)
    assert jnp.allclose(l1_coarse, ref_c, rtol=2e-3, atol=1e-4), (l1_coarse, ref_c)
    assert jnp.allclose(l1_fine, ref_f, rtol=2e-3, atol=1e-4), (l1_fine, ref_f)

    # --- bf16 storage path (halves HBM traffic; kernel upcasts to f32) -----
    p16 = predicted.astype(jnp.bfloat16)
    t16 = target.astype(jnp.bfloat16)
    c16, f16 = loss(p16, t16)
    jax.block_until_ready((c16, f16))
    ref_c16, ref_f16 = _reference(p16.astype(jnp.float32),
                                  t16.astype(jnp.float32), loss.low_w, pad)
    assert jnp.allclose(c16, ref_c16, rtol=2e-3, atol=1e-4), (c16, ref_c16)
    assert jnp.allclose(f16, ref_f16, rtol=2e-3, atol=1e-4), (f16, ref_f16)

    print("KERNEL_OK")
</pallas_src>

<mosaic_0001>
module attributes {stable_mosaic.version = 11 : i64} {
  func.func @_l1_freq_kernel(%arg0: i32, %arg1: i32, %arg2: memref<1x4x16x16xf32, #tpu.memory_space<vmem>>, %arg3: memref<1x4x16x16xf32, #tpu.memory_space<vmem>>, %arg4: memref<16x16xf32, #tpu.memory_space<vmem>>, %arg5: memref<16x16xf32, #tpu.memory_space<vmem>>, %arg6: memref<16x16xf32, #tpu.memory_space<vmem>>, %arg7: memref<16x16xf32, #tpu.memory_space<vmem>>, %arg8: memref<1x1x128xf32, #tpu.memory_space<vmem>>, %arg9: memref<1x1x128xf32, #tpu.memory_space<vmem>>, %arg10: memref<1x16x16xf32, #tpu.memory_space<vmem>>, %arg11: memref<1x16x16xf32, #tpu.memory_space<vmem>>) attributes {dimension_semantics = [#tpu.dimension_semantics<parallel>, #tpu.dimension_semantics<arbitrary>], iteration_bounds = array<i64: 2, 1>, scalar_prefetch = 0 : i64, scratch_operands = 2 : i64, tpu.core_type = #tpu.core_type<tc>, window_params = [{transform_indices = @transform_0, window_bounds = array<i64: 1, 4, 16, 16>}, {transform_indices = @transform_1, window_bounds = array<i64: 1, 4, 16, 16>}, {pipeline_mode = #tpu.pipeline_mode<synchronous>, transform_indices = @transform_2, window_bounds = array<i64: 16, 16>}, {pipeline_mode = #tpu.pipeline_mode<synchronous>, transform_indices = @transform_3, window_bounds = array<i64: 16, 16>}, {transform_indices = @transform_4, window_bounds = array<i64: 16, 16>}, {transform_indices = @transform_5, window_bounds = array<i64: 16, 16>}, {transform_indices = @transform_6, window_bounds = array<i64: 1, 1, 128>}, {transform_indices = @transform_7, window_bounds = array<i64: 1, 1, 128>}]} {
    %c0_i32 = arith.constant 0 : i32
    %0 = arith.cmpi eq, %arg1, %c0_i32 : i32
    %1 = arith.extui %0 : i1 to i32
    %c0_i32_0 = arith.constant 0 : i32
    %2 = arith.cmpi ne, %1, %c0_i32_0 : i32
    scf.if %2 {
      %cst_54 = arith.constant 0.000000e+00 : f32
      %49 = vector.broadcast %cst_54 : f32 to vector<1x16x16xf32>
      %c0_55 = arith.constant 0 : index
      %c0_56 = arith.constant 0 : index
      %c0_57 = arith.constant 0 : index
      %50 = vector.load %arg10[%c0_55, %c0_56, %c0_57] : memref<1x16x16xf32, #tpu.memory_space<vmem>>, vector<1x16x16xf32>
      tpu.vector_store %arg10[%c0_55, %c0_56, %c0_57], %49 {strides = array<i32>} : memref<1x16x16xf32, #tpu.memory_space<vmem>>, vector<1x16x16xf32>,
      %cst_58 = arith.constant 0.000000e+00 : f32
      %51 = vector.broadcast %cst_58 : f32 to vector<1x16x16xf32>
      %c0_59 = arith.constant 0 : index
      %c0_60 = arith.constant 0 : index
      %c0_61 = arith.constant 0 : index
      %52 = vector.load %arg11[%c0_59, %c0_60, %c0_61] : memref<1x16x16xf32, #tpu.memory_space<vmem>>, vector<1x16x16xf32>
      tpu.vector_store %arg11[%c0_59, %c0_60, %c0_61], %51 {strides = array<i32>} : memref<1x16x16xf32, #tpu.memory_space<vmem>>, vector<1x16x16xf32>,
    } else {
    }
    %c0 = arith.constant 0 : index
    %c0_1 = arith.constant 0 : index
    %3 = vector.load %arg4[%c0, %c0_1] : memref<16x16xf32, #tpu.memory_space<vmem>>, vector<16x16xf32>
    %c0_2 = arith.constant 0 : index
    %c0_3 = arith.constant 0 : index
    %4 = vector.load %arg5[%c0_2, %c0_3] : memref<16x16xf32, #tpu.memory_space<vmem>>, vector<16x16xf32>
    %c0_4 = arith.constant 0 : index
    %c0_5 = arith.constant 0 : index
    %5 = vector.load %arg6[%c0_4, %c0_5] : memref<16x16xf32, #tpu.memory_space<vmem>>, vector<16x16xf32>
    %c0_6 = arith.constant 0 : index
    %c0_7 = arith.constant 0 : index
    %6 = vector.load %arg7[%c0_6, %c0_7] : memref<16x16xf32, #tpu.memory_space<vmem>>, vector<16x16xf32>
    %c0_8 = arith.constant 0 : index
    %c0_9 = arith.constant 0 : index
    %c0_10 = arith.constant 0 : index
    %c0_11 = arith.constant 0 : index
    %7 = vector.load %arg2[%c0_8, %c0_9, %c0_10, %c0_11] : memref<1x4x16x16xf32, #tpu.memory_space<vmem>>, vector<1x1x16x16xf32>
    %8 = vector.shape_cast %7 : vector<1x1x16x16xf32> to vector<16x16xf32>
    %c0_12 = arith.constant 0 : index
    %c0_13 = arith.constant 0 : index
    %c0_14 = arith.constant 0 : index
    %c0_15 = arith.constant 0 : index
    %9 = vector.load %arg3[%c0_12, %c0_13, %c0_14, %c0_15] : memref<1x4x16x16xf32, #tpu.memory_space<vmem>>, vector<1x1x16x16xf32>
    %10 = vector.shape_cast %9 : vector<1x1x16x16xf32> to vector<16x16xf32>
    %11 = arith.subf %8, %10 : vector<16x16xf32>
    %c0_16 = arith.constant 0 : index
    %c1 = arith.constant 1 : index
    %c0_17 = arith.constant 0 : index
    %c0_18 = arith.constant 0 : index
    %12 = vector.load %arg2[%c0_16, %c1, %c0_17, %c0_18] : memref<1x4x16x16xf32, #tpu.memory_space<vmem>>, vector<1x1x16x16xf32>
    %13 = vector.shape_cast %12 : vector<1x1x16x16xf32> to vector<16x16xf32>
    %c0_19 = arith.constant 0 : index
    %c1_20 = arith.constant 1 : index
    %c0_21 = arith.constant 0 : index
    %c0_22 = arith.constant 0 : index
    %14 = vector.load %arg3[%c0_19, %c1_20, %c0_21, %c0_22] : memref<1x4x16x16xf32, #tpu.memory_space<vmem>>, vector<1x1x16x16xf32>
    %15 = vector.shape_cast %14 : vector<1x1x16x16xf32> to vector<16x16xf32>
    %16 = arith.subf %13, %15 : vector<16x16xf32>
    %17 = arith.addf %11, %16 : vector<16x16xf32>
    %c0_23 = arith.constant 0 : index
    %c2 = arith.constant 2 : index
    %c0_24 = arith.constant 0 : index
    %c0_25 = arith.constant 0 : index
    %18 = vector.load %arg2[%c0_23, %c2, %c0_24, %c0_25] : memref<1x4x16x16xf32, #tpu.memory_space<vmem>>, vector<1x1x16x16xf32>
    %19 = vector.shape_cast %18 : vector<1x1x16x16xf32> to vector<16x16xf32>
    %c0_26 = arith.constant 0 : index
    %c2_27 = arith.constant 2 : index
    %c0_28 = arith.constant 0 : index
    %c0_29 = arith.constant 0 : index
    %20 = vector.load %arg3[%c0_26, %c2_27, %c0_28, %c0_29] : memref<1x4x16x16xf32, #tpu.memory_space<vmem>>, vector<1x1x16x16xf32>
    %21 = vector.shape_cast %20 : vector<1x1x16x16xf32> to vector<16x16xf32>
    %22 = arith.subf %19, %21 : vector<16x16xf32>
    %23 = arith.addf %17, %22 : vector<16x16xf32>
    %c0_30 = arith.constant 0 : index
    %c3 = arith.constant 3 : index
    %c0_31 = arith.constant 0 : index
    %c0_32 = arith.constant 0 : index
    %24 = vector.load %arg2[%c0_30, %c3, %c0_31, %c0_32] : memref<1x4x16x16xf32, #tpu.memory_space<vmem>>, vector<1x1x16x16xf32>
    %25 = vector.shape_cast %24 : vector<1x1x16x16xf32> to vector<16x16xf32>
    %c0_33 = arith.constant 0 : index
    %c3_34 = arith.constant 3 : index
    %c0_35 = arith.constant 0 : index
    %c0_36 = arith.constant 0 : index
    %26 = vector.load %arg3[%c0_33, %c3_34, %c0_35, %c0_36] : memref<1x4x16x16xf32, #tpu.memory_space<vmem>>, vector<1x1x16x16xf32>
    %27 = vector.shape_cast %26 : vector<1x1x16x16xf32> to vector<16x16xf32>
    %28 = arith.subf %25, %27 : vector<16x16xf32>
    %29 = arith.addf %23, %28 : vector<16x16xf32>
    %cst = arith.constant dense<0.000000e+00> : vector<16x16xf32>
    %30 = tpu.matmul %29, %3, %cst {dimension_numbers = #tpu.dot_dimension_numbers<[1], [0], [0], [1], [0, 0, 1, 1], [], []>} : vector<16x16xf32>, vector<16x16xf32>, vector<16x16xf32> -> vector<16x16xf32>
    %cst_37 = arith.constant dense<0.000000e+00> : vector<16x16xf32>
    %31 = tpu.matmul %29, %4, %cst_37 {dimension_numbers = #tpu.dot_dimension_numbers<[1], [0], [0], [1], [0, 0, 1, 1], [], []>} : vector<16x16xf32>, vector<16x16xf32>, vector<16x16xf32> -> vector<16x16xf32>
    %c0_38 = arith.constant 0 : index
    %c0_39 = arith.constant 0 : index
    %c0_40 = arith.constant 0 : index
    %32 = vector.load %arg10[%c0_38, %c0_39, %c0_40] : memref<1x16x16xf32, #tpu.memory_space<vmem>>, vector<1x16x16xf32>
    %33 = vector.shape_cast %32 : vector<1x16x16xf32> to vector<16x16xf32>
    %cst_41 = arith.constant dense<0.000000e+00> : vector<16x16xf32>
    %34 = tpu.matmul %5, %30, %cst_41 {dimension_numbers = #tpu.dot_dimension_numbers<[0], [0], [1], [1], [0, 1, 1, 1], [], []>} : vector<16x16xf32>, vector<16x16xf32>, vector<16x16xf32> -> vector<16x16xf32>
    %35 = arith.addf %33, %34 : vector<16x16xf32>
    %c0_42 = arith.constant 0 : index
    %c0_43 = arith.constant 0 : index
    %c0_44 = arith.constant 0 : index
    %36 = vector.load %arg10[%c0_42, %c0_43, %c0_44] : memref<1x16x16xf32, #tpu.memory_space<vmem>>, vector<1x16x16xf32>
    %37 = vector.shape_cast %36 : vector<1x16x16xf32> to vector<16x16xf32>
    %38 = vector.shape_cast %35 : vector<16x16xf32> to vector<1x16x16xf32>
    tpu.vector_store %arg10[%c0_42, %c0_43, %c0_44], %38 {strides = array<i32>} : memref<1x16x16xf32, #tpu.memory_space<vmem>>, vector<1x16x16xf32>,
    %c0_45 = arith.constant 0 : index
    %c0_46 = arith.constant 0 : index
    %c0_47 = arith.constant 0 : index
    %39 = vector.load %arg11[%c0_45, %c0_46, %c0_47] : memref<1x16x16xf32, #tpu.memory_space<vmem>>, vector<1x16x16xf32>
    %40 = vector.shape_cast %39 : vector<1x16x16xf32> to vector<16x16xf32>
    %cst_48 = arith.constant dense<0.000000e+00> : vector<16x16xf32>
    %41 = tpu.matmul %6, %31, %cst_48 {dimension_numbers = #tpu.dot_dimension_numbers<[0], [0], [1], [1], [0, 1, 1, 1], [], []>} : vector<16x16xf32>, vector<16x16xf32>, vector<16x16xf32> -> vector<16x16xf32>
    %42 = arith.addf %40, %41 : vector<16x16xf32>
    %c0_49 = arith.constant 0 : index
    %c0_50 = arith.constant 0 : index
    %c0_51 = arith.constant 0 : index
    %43 = vector.load %arg11[%c0_49, %c0_50, %c0_51] : memref<1x16x16xf32, #tpu.memory_space<vmem>>, vector<1x16x16xf32>
    %44 = vector.shape_cast %43 : vector<1x16x16xf32> to vector<16x16xf32>
    %45 = vector.shape_cast %42 : vector<16x16xf32> to vector<1x16x16xf32>
    tpu.vector_store %arg11[%c0_49, %c0_50, %c0_51], %45 {strides = array<i32>} : memref<1x16x16xf32, #tpu.memory_space<vmem>>, vector<1x16x16xf32>,
    %c0_i32_52 = arith.constant 0 : i32
    %46 = arith.cmpi eq, %arg1, %c0_i32_52 : i32
    %47 = arith.extui %46 : i1 to i32
    %c0_i32_53 = arith.constant 0 : i32
    %48 = arith.cmpi ne, %47, %c0_i32_53 : i32
    scf.if %48 {
      %c0_54 = arith.constant 0 : index
      %c0_55 = arith.constant 0 : index
      %c0_56 = arith.constant 0 : index
      %49 = vector.load %arg10[%c0_54, %c0_55, %c0_56] : memref<1x16x16xf32, #tpu.memory_space<vmem>>, vector<1x16x16xf32>
      %c0_57 = arith.constant 0 : index
      %c0_58 = arith.constant 0 : index
      %c0_59 = arith.constant 0 : index
      %50 = vector.load %arg11[%c0_57, %c0_58, %c0_59] : memref<1x16x16xf32, #tpu.memory_space<vmem>>, vector<1x16x16xf32>
      %51 = arith.subf %50, %49 : vector<1x16x16xf32>
      %cst_60 = arith.constant 1.000000e+00 : f32
      %52 = vector.broadcast %cst_60 : f32 to vector<1x1x128xf32>
      %53 = math.absf %49 : vector<1x16x16xf32>
      %54 = vector.shape_cast %53 : vector<1x16x16xf32> to vector<1x1x16x16xf32>
      %cst_61 = arith.constant dense<0.000000e+00> : vector<1xf32>
      %55 = vector.multi_reduction <add>, %54, %cst_61 [1, 2, 3] : vector<1x1x16x16xf32> to vector<1xf32>
      %56 = vector.shape_cast %55 : vector<1xf32> to vector<1x1x1x1xf32>
      %57 = vector.extract %56[0, 0, 0, 0] : f32 from vector<1x1x1x1xf32>
      %58 = vector.broadcast %57 : f32 to vector<1x1x128xf32>
      %59 = arith.mulf %58, %52 : vector<1x1x128xf32>
      %c0_62 = arith.constant 0 : index
      %c0_63 = arith.constant 0 : index
      %c0_64 = arith.constant 0 : index
      %60 = vector.load %arg8[%c0_62, %c0_63, %c0_64] : memref<1x1x128xf32, #tpu.memory_space<vmem>>, vector<1x1x128xf32>
      tpu.vector_store %arg8[%c0_62, %c0_63, %c0_64], %59 {strides = array<i32>} : memref<1x1x128xf32, #tpu.memory_space<vmem>>, vector<1x1x128xf32>,
      %61 = math.absf %51 : vector<1x16x16xf32>
      %62 = vector.shape_cast %61 : vector<1x16x16xf32> to vector<1x1x16x16xf32>
      %cst_65 = arith.constant dense<0.000000e+00> : vector<1xf32>
      %63 = vector.multi_reduction <add>, %62, %cst_65 [1, 2, 3] : vector<1x1x16x16xf32> to vector<1xf32>
      %64 = vector.shape_cast %63 : vector<1xf32> to vector<1x1x1x1xf32>
      %65 = vector.extract %64[0, 0, 0, 0] : f32 from vector<1x1x1x1xf32>
      %66 = vector.broadcast %65 : f32 to vector<1x1x128xf32>
      %67 = arith.mulf %66, %52 : vector<1x1x128xf32>
      %c0_66 = arith.constant 0 : index
      %c0_67 = arith.constant 0 : index
      %c0_68 = arith.constant 0 : index
      %68 = vector.load %arg9[%c0_66, %c0_67, %c0_68] : memref<1x1x128xf32, #tpu.memory_space<vmem>>, vector<1x1x128xf32>
      tpu.vector_store %arg9[%c0_66, %c0_67, %c0_68], %67 {strides = array<i32>} : memref<1x1x128xf32, #tpu.memory_space<vmem>>, vector<1x1x128xf32>,
    } else {
    }
    return
  }
  func.func @transform_0(%arg0: i32, %arg1: i32) -> (i32, i32, i32, i32) {
    %c0_i32 = arith.constant 0 : i32
    %c0_i32_0 = arith.constant 0 : i32
    %c0_i32_1 = arith.constant 0 : i32
    return %arg0, %c0_i32, %arg1, %c0_i32_0 : i32, i32, i32, i32
  }
  func.func @transform_1(%arg0: i32, %arg1: i32) -> (i32, i32, i32, i32) {
    %c0_i32 = arith.constant 0 : i32
    %c0_i32_0 = arith.constant 0 : i32
    %c0_i32_1 = arith.constant 0 : i32
    return %arg0, %c0_i32, %arg1, %c0_i32_0 : i32, i32, i32, i32
  }
  func.func @transform_2(%arg0: i32, %arg1: i32) -> (i32, i32) {
    %c0_i32 = arith.constant 0 : i32
    %c0_i32_0 = arith.constant 0 : i32
    %c0_i32_1 = arith.constant 0 : i32
    return %c0_i32, %c0_i32_0 : i32, i32
  }
  func.func @transform_3(%arg0: i32, %arg1: i32) -> (i32, i32) {
    %c0_i32 = arith.constant 0 : i32
    %c0_i32_0 = arith.constant 0 : i32
    %c0_i32_1 = arith.constant 0 : i32
    return %c0_i32, %c0_i32_0 : i32, i32
  }
  func.func @transform_4(%arg0: i32, %arg1: i32) -> (i32, i32) {
    %c0_i32 = arith.constant 0 : i32
    %c0_i32_0 = arith.constant 0 : i32
    return %arg1, %c0_i32 : i32, i32
  }
  func.func @transform_5(%arg0: i32, %arg1: i32) -> (i32, i32) {
    %c0_i32 = arith.constant 0 : i32
    %c0_i32_0 = arith.constant 0 : i32
    return %arg1, %c0_i32 : i32, i32
  }
  func.func @transform_6(%arg0: i32, %arg1: i32) -> (i32, i32, i32) {
    %c0_i32 = arith.constant 0 : i32
    %c0_i32_0 = arith.constant 0 : i32
    %c0_i32_1 = arith.constant 0 : i32
    return %arg0, %c0_i32, %c0_i32_0 : i32, i32, i32
  }
  func.func @transform_7(%arg0: i32, %arg1: i32) -> (i32, i32, i32) {
    %c0_i32 = arith.constant 0 : i32
    %c0_i32_0 = arith.constant 0 : i32
    %c0_i32_1 = arith.constant 0 : i32
    return %arg0, %c0_i32, %c0_i32_0 : i32, i32, i32
  }
}

</mosaic_0001>

<bundles_post_ra>
// kernel: tpu_custom_call.1
= control target key start
LH: loop header
LB: loop body
LE: loop exit
PB: predicated region body
PF: predicated region fallthrough
CT: control target
= control target key end

     0   :  { %s1724_s0 = inlined_call_operand.hbm [shape: f32[2,4,16,16], index: 0, kind: input, shape index: {}]   ;;  %s1725_s1 = inlined_call_operand.hbm [shape: f32[2,4,16,16], index: 1, kind: input, shape index: {}]   ;;  %s1726_s2 = inlined_call_operand.hbm [shape: f32[16,16], index: 2, kind: input, shape index: {}]   ;;  %s1727_s3 = inlined_call_operand.hbm [shape: f32[16,16], index: 3, kind: input, shape index: {}]   ;;  %s1728_s4 = inlined_call_operand.hbm [shape: f32[16,16], index: 4, kind: input, shape index: {}]   ;;  %s1729_s5 = inlined_call_operand.hbm [shape: f32[16,16], index: 5, kind: input, shape index: {}]   ;;  %s1730_s6 = inlined_call_operand.hbm [shape: f32[2,1,128], index: 6, kind: output, shape index: {0}]   ;;  %s1731_s7 = inlined_call_operand.hbm [shape: f32[2,1,128], index: 7, kind: output, shape index: {1}]  }
   0x1   :  { %1739 = sst [smem:[#allocation29_spill]] %s1726_s2 }
   0x2   :  { %1740 = sst [smem:[#allocation30_spill]] %s1727_s3 }
   0x3   :  { %1741 = sst [smem:[#allocation31_spill]] %s1728_s4 }
   0x4   :  { %1742 = sst [smem:[#allocation32_spill]] %s1729_s5 }
   0x5   :  { %13 = vsyncpa [#allocation5], 0 }
   0x6   :  { %15 = vsyncpa [#allocation5 + $0x1], 0 }
   0x7   :  { %16 = vsyncpa [#allocation8], 0 }
   0x8   :  { %18 = vsyncpa [#allocation8 + $0x1], 0 }
   0x9   :  { %19 = vsyncpa [#allocation11], 0 }
   0xa   :  { %20 = vsyncpa [#allocation14], 0 }
   0xb   :  { %21 = vsyncpa [#allocation6], 0 }
   0xc   :  { %23 = vsyncpa [#allocation6 + $0x1], 0 }
   0xd   :  { %24 = vsyncpa [#allocation17], 0 }
   0xe   :  { %26 = vsyncpa [#allocation17 + $0x1], 0  ;;  %s1464_s24 = smov 0   ;;  %s1466_s25 = smov 0  }
   0xf   :  { %s1468_s26 = smov 0   ;;  %s1470_s27 = smov 0  }
  0x10   :  { %s1472_s28 = smov 0   ;;  %s1474_s29 = smov 0  }
  0x11 LB: > { %1743 = sst [smem:[#allocation25_spill]] %s1403_s26  ;;  %s1495_s30 = sadd.s32 4294967295, %s1415_s29   ;;  %s1415_s29 = sphi %s1474_s29, %s32_s29   ;;  %s1411_s28 = sphi %s1472_s28, %s1762_s28   ;;  %s1407_s27 = sphi %s1470_s27, %s1761_s27   ;;  %s1403_s26 = sphi %s1468_s26, %s1760_s26   ;;  %s1399_s25 = sphi %s1466_s25, %s1764_s25   ;;  %s1395_s24 = sphi %s1464_s24, %s1763_s24  }
  0x12   : > { %1744 = sst [smem:[#allocation26_spill]] %s1411_s28  ;;  %s941_s8 = sadd.s32 4294967294, %s1415_s29  }
  0x13   : > { %p66_p0 = scmp.ne.s32.totalorder %s1399_s25, %s1395_s24  ;;  %p67_p1 = scmp.eq.s32.totalorder %s1495_s30, 0 }
  0x14   : > { %p212_p2 = scmp.eq.s32.totalorder %s1495_s30, 1  ;;  %p218_p3 = scmp.eq.s32.totalorder %s941_s8, 1 }
  0x15   : > { %p1504_p4 = por %p67_p1, %p66_p0  ;;  %p942_p5 = scmp.ge.s32.totalorder %s1415_s29, 1 }
  0x16   : > { %p1509_p6 = por %p218_p3, %p66_p0  ;;  %p251_p7 = scmp.lt.s32.totalorder %s1415_s29, 3 }
  0x17   : > { %s1747_s2 = sld [smem:[#allocation29_spill]]  ;;  %s1417_s15 = smov [#allocation9]  }
  0x18   : > { %p1517_p8 = pnand %p942_p5, %p251_p7  ;;  %s264_s16 = sshll.u32 %s1417_s15, 4  ;;  %s265_s16 = int_to_ptr.vmem [resolvable:$true] %s264_s16 }
  0x19   : > { %p947_p11 = scmp.ge.s32.totalorder %s1415_s29, 2  ;;  %s1750_s3 = sld [smem:[#allocation30_spill]] }
  0x1a   : > { %p1013_p9 = pneg %p1517_p8  ;;  %s1732_s21 = smov 128  }
  0x1b   : > { %s1734_s22 = smov 8   ;;  %s1420_s23 = smov [#allocation10]  }
  0x1c   : > { %p1525_p10 = pnand %p1013_p9, %p67_p1  ;;  %s278_s8 = sshll.u32 %s1420_s23, 4  ;;  %s279_s8 = int_to_ptr.vmem [resolvable:$true] %s278_s8 }
  0x1d   : > { %s262_s13 = sshll.u32 %s1747_s2, 4  ;;  %s1751_s4 = sld [smem:[#allocation31_spill]]  ;;  %s263_s13 = int_to_ptr.hbm [resolvable:$true] %s262_s13 }
  0x1e   : > { %1016 = dma.hbm_to_vmem [thread:$0]  (!%p1525_p10), %s263_s13, 256, %s265_s16, [#allocation8], %s1732_s21, %s1732_s21, %s1734_s22  }
  0x1f   : > { %s276_s20 = sshll.u32 %s1750_s3, 4  ;;  %s1752_s5 = sld [smem:[#allocation32_spill]]  ;;  %s277_s20 = int_to_ptr.hbm [resolvable:$true] %s276_s20 }
  0x20   : > { %1019 = dma.hbm_to_vmem [thread:$0]  (!%p1525_p10), %s277_s20, 256, %s279_s8, [#allocation11], %s1732_s21, %s1732_s21, %s1734_s22  }
  0x21   : > { %s1421_s19 = smov [#allocation12]   ;;  %s1422_s11 = smov [#allocation13]  }
  0x22   : > { %s295_s23 = sshll.u32 %s1421_s19, 4  ;;  %s312_s12 = sshll.u32 %s1422_s11, 4  ;;  %s296_s23 = int_to_ptr.vmem [resolvable:$true] %s295_s23  ;;  %s313_s12 = int_to_ptr.vmem [resolvable:$true] %s312_s12 }
  0x23   : > { %s293_s15 = sshll.u32 %s1751_s4, 4  ;;  %s44_s20 = sadd.s32 1, %s1411_s28  ;;  %s294_s15 = int_to_ptr.hbm [resolvable:$true] %s293_s15 }
  0x24   : > { %1022 = dma.hbm_to_vmem [thread:$0]  (!%p1525_p10), %s294_s15, 256, %s296_s23, [#allocation11], %s1732_s21, %s1732_s21, %s1734_s22  }
  0x25   : > { %s310_s18 = sshll.u32 %s1752_s5, 4  ;;  %s53_s8 = sadd.s32 1, %s1403_s26  ;;  %s311_s18 = int_to_ptr.hbm [resolvable:$true] %s310_s18 }
  0x26   : > { %1025 = dma.hbm_to_vmem [thread:$0]  (!%p1525_p10), %s311_s18, 256, %s313_s12, [#allocation14], %s1732_s21, %s1732_s21, %s1734_s22  }
  0x27   : > { %p46_p12 = scmp.ge.s32.totalorder %s44_s20, 2  ;;  %p60_p13 = scmp.ne.s32.totalorder %s1403_s26, %s1399_s25 }
  0x28   : > { %p61_p0 = scmp.eq.s32.totalorder %s1415_s29, 0  ;;  %p1044_p3 = scmp.lt.s32.totalorder %s1415_s29, 2 }
  0x29   : > { %s1766_s20 = smov (%p46_p12, %s44_s20), 0  ;;  %p1573_p7 = por %p212_p2, %p60_p13 }
  0x2a   : > { %1753 = sst [smem:[#allocation27_spill]] %s1766_s20  ;;  %p1567_p5 = por %p61_p0, %p60_p13 }
  0x2b   : > { %s48_s13 = ssub.s32 %s1411_s28, %s1766_s20  ;;  %s326_s16 = sand.u32 1, %s1403_s26  }
  0x2c   : > { %p51_p9 = scmp.eq.s32.totalorder %s48_s13, 0  ;;  %s948_s18 = sshll.u32 %s326_s16, 6 }
  0x2d   : > { %s983_s19 = sshll.u32 %s1411_s28, 6  ;;  %s330_s2 = scalar_lea.vmem [#allocation4], %s948_s18 }
  0x2e   : > { %s1582_s23 = scalar_select %p51_p9, %s1403_s26, %s53_s8  }
  0x2f   : > { %s337_s21 = scalar_lea.hbm %s1724_s0, %s983_s19  ;;  %s340_s3 = sshll.u32 %s330_s2, 4  ;;  %s341_s3 = int_to_ptr.vmem [resolvable:$true] %s340_s3 }
  0x30   : > { %1756 = sst [smem:[#allocation28_spill]] %s1582_s23  ;;  %s338_s22 = sshll.u32 %s337_s21, 4  ;;  %s339_s22 = int_to_ptr.hbm [resolvable:$true] %s338_s22 }
  0x31   : > { %p1027_p2 = pnand %p1044_p3, %p1567_p5  ;;  %s361_s13 = scalar_lea.hbm %s1725_s1, %s983_s19 }
  0x32   : > { %s354_s20 = scalar_lea.vmem [#allocation7], %s948_s18  ;;  %s362_s28 = sshll.u32 %s361_s13, 4  ;;  %s363_s28 = int_to_ptr.hbm [resolvable:$true] %s362_s28 }
  0x33   : > { %s364_s8 = sshll.u32 %s354_s20, 4  ;;  %s327_s23 = scalar_lea.sflag [#allocation5], %s326_s16  ;;  %s365_s8 = int_to_ptr.vmem [resolvable:$true] %s364_s8 }
  0x34   : > { %s1757_s26 = smov 8   ;;  %s1758_s11 = smov 128  }
  0x35   : > { %1029 = dma.hbm_to_vmem [thread:$0]  (!%p1027_p2), %s339_s22, 1024, %s341_s3, %s327_s23, %s1758_s11, %s1758_s11, %s1757_s26  }
  0x36   : > { %s350_s2 = sand.u32 1, %s1415_s29   ;;  %376 = sbr.rel (%p1517_p8) target bundleno = 586 (0x24a), region = 44 }
  0x37   : > { %s351_s21 = scalar_lea.sflag [#allocation8], %s350_s2  ;;  %s1604_s4 = sand.u32 (!%p1517_p8), 1, %s1399_s25  }
  0x38   : > { %1032 = dma.hbm_to_vmem [thread:$0]  (!%p1027_p2), %s363_s28, 1024, %s365_s8, %s351_s21, %s1758_s11, %s1758_s11, %s1757_s26  }
  0x39   : > { %s955_s5 = sshll.u32 (!%p1517_p8), %s1604_s4, 6  ;;  %s379_s20 = scalar_lea.sflag (!%p1517_p8), [#allocation5], %s1604_s4 }
  0x3a   : > { %s1608_s3 = scalar_lea.vmem (!%p1517_p8), [#allocation4], %s955_s5 }
  0x3b   : > { %1366 = dma.done.wait (%p1504_p4), %s379_s20, 1024  }
  0x3c   : > { %1368 = vsyncadd (%p1504_p4), %s379_s20, 4294966272  ;;  %s388_s26 = sand.u32 1, %s1495_s30   ;;  %s1615_s14 = scalar_lea.vmem [#allocation7], %s955_s5 }
  0x3d   : > { %s389_s28 = scalar_lea.sflag [#allocation8], %s388_s26 }
  0x3e   : > { %1370 = dma.done.wait (%p1504_p4), %s389_s28, 1024  }
  0x3f   : > { %1372 = vsyncadd (%p1504_p4), %s389_s28, 4294966272 }
  0x40   : > { %1374 = dma.done.wait (%p67_p1), [#allocation8], 256  }
  0x41   : > { %1376 = vsyncadd (%p67_p1), [#allocation8], 4294967040 }
  0x42   : > { %1378 = dma.done.wait (%p67_p1), [#allocation11], 512  }
  0x43   : > { %1380 = vsyncadd (%p67_p1), [#allocation11], 4294966784 }
  0x44   : > { %1382 = dma.done.wait (%p67_p1), [#allocation14], 256  }
  0x45   : > { %1384 = vsyncadd (%p67_p1), [#allocation14], 4294967040  ;;  %v471_v0 = vld [vmem:[#allocation13] sm:$0xff]  ;;  %v469_v1 = vld [vmem:[#allocation12] sm:$0xff]  ;;  %vm460_vm0 = vcmask 130048   ;;  %v1423_v40 = vmov 0.0   ;;  %s750_s22 = scalar_lea.hbm %s1730_s6, %s1407_s27  ;;  %s763_s13 = scalar_lea.hbm %s1731_s7, %s1407_s27 }
  0x46   : > { %631 = vxpose.xlu1.b32.start [1/2] (short) (narrow) %v471_v0, 16  ;;  %564 = vxpose.xlu0.b32.start [1/2] (short) (narrow) %v469_v1, 16  ;;  %v466_v2 = vld [vmem:[#allocation9 + $0x8] sm:$0xff]  ;;  %v465_v3 = vld [vmem:[#allocation9] sm:$0xff]  ;;  %v961_v6 = vld [vmem:[%s1608_s3 + $0x10] sm:$0xff]  ;;  %461 = vst.msk [vmem:[#allocation2] sm:$0xff] %vm460_vm0, %v1423_v40 }
  0x47   : > { %530 = vmatpush.msra.mxu0 %v466_v2  ;;  %v473_v4 = vld [vmem:[%s1608_s3] sm:$0xff]  ;;  %v963_v8 = vld [vmem:[%s1615_s14 + $0x10] sm:$0xff]  ;;  %v472_v11 = vld [vmem:[#allocation13 + $0x8] sm:$0xff]  ;;  %462 = vst.msk [vmem:[#allocation2 + $0x8] sm:$0xff] %vm460_vm0, %v1423_v40  ;;  %s445_s15 = scalar_lea.vmem [#allocation15], %s1604_s4  ;;  %s754_s18 = sshll.u32 %s750_s22, 4  ;;  %s755_s18 = int_to_ptr.hbm [resolvable:$true] %s754_s18 }
  0x48   : > { %v475_v5 = vld [vmem:[%s1615_s14] sm:$0xff]  ;;  %v470_v12 = vld [vmem:[#allocation12 + $0x8] sm:$0xff]  ;;  %v485_v13 = vsub.f32 %v961_v6, %v963_v8  ;;  %v969_v15 = vld [vmem:[%s1608_s3 + $0x30] sm:$0xff]  ;;  %463 = vst.msk [vmem:[#allocation3] sm:$0xff] %vm460_vm0, %v1423_v40  ;;  %s752_s16 = sshll.u32 %s445_s15, 4  ;;  %s738_s8 = scalar_lea.sflag [#allocation6], %s1604_s4  ;;  %s753_s16 = int_to_ptr.vmem [resolvable:$true] %s752_s16 }
  0x49   : > { %v477_v7 = vsub.f32 %v473_v4, %v475_v5  ;;  %v965_v9 = vld [vmem:[%s1608_s3 + $0x20] sm:$0xff]  ;;  %531 = vmatpush.msra.mxu0 %v465_v3  ;;  %v971_v16 = vld [vmem:[%s1615_s14 + $0x30] sm:$0xff]  ;;  %v468_v17 = vld [vmem:[#allocation10 + $0x8] sm:$0xff]  ;;  %464 = vst.msk [vmem:[#allocation3 + $0x8] sm:$0xff] %vm460_vm0, %v1423_v40  ;;  %s1299_s11 = sshra.s32 %s755_s18, 4  ;;  %s1305_s20 = scalar_lea.hbm %s1730_s6, 2  ;;  %s1300_s11 = int_to_ptr.hbm [resolvable:$true] %s1299_s11 }
  0x4a   : > { %v967_v10 = vld [vmem:[%s1615_s14 + $0x20] sm:$0xff]  ;;  %553 = vmatpush.msra.mxu1 %v468_v17  ;;  %v467_v18 = vld [vmem:[#allocation10] sm:$0xff]  ;;  %v474_v19 = vld [vmem:[%s1608_s3 + $0x8] sm:$0xff]  ;;  %v505_v22 = vsub.f32 %v969_v15, %v971_v16  ;;  %s1301_s2 = scalar_lea.hbm %s1300_s11, 1  ;;  %p1306_p10 = scmp.lt.s32.totalorder %s1300_s11, %s1730_s6 }
  0x4b   : > { %v495_v14 = vsub.f32 %v965_v9, %v967_v10  ;;  %v476_v20 = vld [vmem:[%s1615_s14 + $0x8] sm:$0xff]  ;;  %v487_v21 = vadd.f32 %v485_v13, %v477_v7  ;;  %v962_v24 = vld [vmem:[%s1608_s3 + $0x18] sm:$0xff]  ;;  %p1302_p1 = scmp.ne.s32.totalorder %s1300_s11, %s1301_s2  ;;  %p1307_p12 = scmp.lt.s32.totalorder %s1305_s20, %s1301_s2 }
  0x4c   : > { %v478_v23 = vsub.f32 %v474_v19, %v476_v20  ;;  %v964_v25 = vld [vmem:[%s1615_s14 + $0x18] sm:$0xff]  ;;  %v966_v26 = vld [vmem:[%s1608_s3 + $0x28] sm:$0xff]  ;;  %554 = vmatpush.msra.mxu1 %v467_v18 }
  0x4d   : > { %v486_v27 = vsub.f32 %v962_v24, %v964_v25  ;;  %v968_v28 = vld [vmem:[%s1615_s14 + $0x28] sm:$0xff]  ;;  %v497_v29 = vadd.f32 %v495_v14, %v487_v21  ;;  %v970_v32 = vld [vmem:[%s1608_s3 + $0x38] sm:$0xff]  ;;  %v562_v47 = vld [vmem:[#allocation2] sm:$0xff]  ;;  %p1303_p4 = pnand %p1302_p1, %p1573_p7  ;;  %p1308_p13 = por %p1307_p12, %p1306_p10 }
  0x4e   : > { %v496_v30 = vsub.f32 %v966_v26, %v968_v28  ;;  %632 = vxpose.xlu1.b32.end [2/2] (short) (narrow) %v472_v11, 16  ;;  %565 = vxpose.xlu0.b32.end [2/2] (short) (narrow) %v470_v12, 16  ;;  %v972_v33 = vld [vmem:[%s1615_s14 + $0x38] sm:$0xff]  ;;  %v563_v53 = vld [vmem:[#allocation2 + $0x8] sm:$0xff] }
  0x4f   : > { %v488_v31 = vadd.f32 %v486_v27, %v478_v23  ;;  %v507_v34 = vadd.f32 %v505_v22, %v497_v29  ;;  %v506_v36 = vsub.f32 %v970_v32, %v972_v33  ;;  %v629_v48 = vld [vmem:[#allocation3] sm:$0xff]  ;;  %p1304_p8 = pneg %p1303_p4 }
  0x50   : > { %v630_v54 = vld [vmem:[#allocation3 + $0x8] sm:$0xff] }
  0x51   : > { %973 = vmatmul.msk.f32.vlgmr.msra.gmra.mxu0 %vm460_vm0, %v507_v34  ;;  %975 = vmatmul.msk.f32.vlgmr.msra.gmra.mxu1 %vm460_vm0, %v507_v34  ;;  %v498_v35 = vadd.f32 %v496_v30, %v488_v31  ;;  %p1309_p0 = pnand %p1308_p13, %p1304_p8 }
  0x53   : > { %v508_v37 = vadd.f32 %v506_v36, %v498_v35 }
  0x59   : > { %974 = vmatmul.msk.f32.gmra.mxu0 %vm460_vm0, %v508_v37  ;;  %976 = vmatmul.msk.f32.gmra.mxu1 %vm460_vm0, %v508_v37 }
  0xce   : > { %v533_v38 = vpop.f32.mrf.mxu0  ;;  %v556_v39 = vpop.f32.mrf.mxu1 }
  0xd6   : > { %v536_v41 = vpop.f32.mrf.mxu0  ;;  %v559_v42 = vpop.f32.mrf.mxu1 }
  0xd7   : > { %616 = vmatpush.msra.mxu2 %v536_v41  ;;  %683 = vmatpush.msra.mxu3 %v559_v42 }
  0xd9   : > { %617 = vmatpush.msra.mxu2 %v533_v38  ;;  %684 = vmatpush.msra.mxu3 %v556_v39 }
  0xea   : > { %v647_v43 = vpop.trf.xlu1  ;;  %v580_v44 = vpop.trf.xlu0 }
  0xeb   : > { %977 = vmatmul.msk.f32.vlgmr.msra.gmra.mxu2 %vm460_vm0, %v580_v44  ;;  %979 = vmatmul.msk.f32.vlgmr.msra.gmra.mxu3 %vm460_vm0, %v647_v43 }
  0xf2   : > { %v648_v45 = vpop.trf.xlu1  ;;  %v581_v46 = vpop.trf.xlu0 }
  0xf3   : > { %978 = vmatmul.msk.f32.gmra.mxu2 %vm460_vm0, %v581_v46  ;;  %980 = vmatmul.msk.f32.gmra.mxu3 %vm460_vm0, %v648_v45 }
 0x16e   : > { %v619_v49 = vpop.f32.mrf.mxu2  ;;  %v686_v50 = vpop.f32.mrf.mxu3 }
 0x16f   : > { %v625_v51 = vadd.f32 %v619_v49, %v562_v47  ;;  %v692_v52 = vadd.f32 %v686_v50, %v629_v48 }
 0x171   : > { %627 = vst.msk [vmem:[#allocation2] sm:$0xff] %vm460_vm0, %v625_v51 }
 0x172   : > { %694 = vst.msk [vmem:[#allocation3] sm:$0xff] %vm460_vm0, %v692_v52 }
 0x176   : > { %v622_v55 = vpop.f32.mrf.mxu2  ;;  %v689_v56 = vpop.f32.mrf.mxu3 }
 0x177   : > { %v626_v57 = vadd.f32 %v622_v55, %v563_v53  ;;  %v693_v58 = vadd.f32 %v689_v56, %v630_v54 }
 0x178   : > { %v699_v59 = vld [vmem:[#allocation2] sm:$0xff] }
 0x179   : > { %628 = vst.msk [vmem:[#allocation2 + $0x8] sm:$0xff] %vm460_vm0, %v626_v57  ;;  %v705_v60 = vand.u32 2147483647, %v699_v59  ;;  %v701_v62 = vld [vmem:[#allocation3] sm:$0xff] }
 0x17a   : > { %695 = vst.msk [vmem:[#allocation3 + $0x8] sm:$0xff] %vm460_vm0, %v693_v58  ;;  %v703_v4 = vsub.f32 %v701_v62, %v699_v59 }
 0x17b   : > { %v707_v2 = vsel %vm460_vm0, %v705_v60, 0.0 }
 0x17c   : > { %v721_v7 = vand.u32 2147483647, %v703_v4 }
 0x17e   : > { %v723_v9 = vsel %vm460_vm0, %v721_v7, 0.0 }
 0x180   : > { %v700_v61 = vld [vmem:[#allocation2 + $0x8] sm:$0xff] }
 0x181   : > { %v706_v63 = vand.u32 2147483647, %v700_v61  ;;  %v702_v0 = vld [vmem:[#allocation3 + $0x8] sm:$0xff] }
 0x182   : > { %v704_v1 = vsub.f32 %v702_v0, %v700_v61 }
 0x183   : > { %v708_v3 = vsel %vm460_vm0, %v706_v63, 0.0 }
 0x184   : > { %v709_v5 = vadd.f32 %v708_v3, %v707_v2  ;;  %v722_v6 = vand.u32 2147483647, %v704_v1 }
 0x186   : > { %710 = vadd.xlane.f32.xlu2 %v709_v5  ;;  %v724_v8 = vsel %vm460_vm0, %v722_v6, 0.0 }
 0x187   : > { %v725_v10 = vadd.f32 %v724_v8, %v723_v9 }
 0x18e   : > { %726 = vadd.xlane.f32.xlu2 %v725_v10 }
 0x1f9   : > { %v711_v11 = vpop.xlane.xlu2 %710 }
 0x1fa   : > { %v712_v12 = vrot.slane %v711_v11, 4 }
 0x1fc   : > { %v713_v13 = vadd.f32 %v712_v12, %v711_v11 }
 0x1fe   : > { %v714_v14 = vrot.slane %v713_v13, 2 }
 0x200   : > { %v715_v15 = vadd.f32 %v714_v14, %v713_v13 }
 0x201   : > { %v727_v16 = vpop.xlane.xlu2 %726 }
 0x202   : > { %v728_v17 = vrot.slane %v727_v16, 4  ;;  %v716_v18 = vrot.slane %v715_v15, 1 }
 0x204   : > { %v729_v19 = vadd.f32 %v728_v17, %v727_v16  ;;  %v717_v20 = vadd.f32 %v716_v18, %v715_v15 }
 0x206   : > { %v730_v21 = vrot.slane %v729_v19, 2  ;;  %985 = vpush %v717_v20 }
 0x208   : > { %v731_v22 = vadd.f32 %v730_v21, %v729_v19 }
 0x20a   : > { %v732_v23 = vrot.slane %v731_v22, 1 }
 0x20c   : > { %v733_v24 = vadd.f32 %v732_v23, %v731_v22 }
 0x20e   : > { %987 = vpush %v733_v24 }
 0x237   : > { %s986_s19 = spop %985 }
 0x238   : > { %v719_v25 = vstv %s986_s19 }
 0x239   : > { %720 = vst [vmem:[%s445_s15] sm:$0x1] %v719_v25 }
 0x23a   : > { %1312 = shalt.err (!%p1309_p0)
}
 0x23b   : > { %1009 = dma.vmem_to_hbm [thread:$0]  (%p1573_p7), %s753_s16, 16, %s755_s18, %s738_s8  }
 0x23c   : > { %s451_s27 = scalar_lea.vmem [#allocation16], %s1604_s4  ;;  %s767_s14 = sshll.u32 %s763_s13, 4  ;;  %s768_s14 = int_to_ptr.hbm [resolvable:$true] %s767_s14 }
 0x23d   : > { %s765_s28 = sshll.u32 %s451_s27, 4  ;;  %s742_s9 = scalar_lea.sflag [#allocation17], %s1604_s4  ;;  %s766_s28 = int_to_ptr.vmem [resolvable:$true] %s765_s28 }
 0x23e   : > { %s1327_s22 = sshra.s32 %s768_s14, 4  ;;  %s1333_s16 = scalar_lea.hbm %s1731_s7, 2  ;;  %s1328_s22 = int_to_ptr.hbm [resolvable:$true] %s1327_s22 }
 0x23f   : > { %s988_s30 = spop %987  ;;  %s1329_s15 = scalar_lea.hbm %s1328_s22, 1 }
 0x240   : > { %v735_v26 = vstv %s988_s30  ;;  %p1330_p3 = scmp.ne.s32.totalorder %s1328_s22, %s1329_s15  ;;  %p1334_p2 = scmp.lt.s32.totalorder %s1328_s22, %s1731_s7 }
 0x241   : > { %736 = vst [vmem:[%s451_s27] sm:$0x1] %v735_v26  ;;  %p1335_p1 = scmp.lt.s32.totalorder %s1333_s16, %s1329_s15 }
 0x242   : > { %p1331_p5 = pnand %p1330_p3, %p1573_p7 }
 0x243   : > { %p1336_p4 = por %p1335_p1, %p1334_p2 }
 0x244   : > { %p1332_p9 = pneg %p1331_p5 }
 0x246   : > { %p1337_p8 = pnand %p1336_p4, %p1332_p9 }
 0x248   : > { %1340 = shalt.err (!%p1337_p8)
}
 0x249   : > { %1010 = dma.vmem_to_hbm [thread:$0]  (%p1573_p7), %s766_s28, 16, %s768_s14, %s742_s9  }
 0x24a PF: > { %s779_s4 = sand.u32 1, %s1395_s24   ;;  %p1034_p10 = pnand %p947_p11, %p1509_p6 }
 0x24b   : > { %s780_s13 = scalar_lea.sflag [#allocation6], %s779_s4 }
 0x24c   : > { %p1035_p12 = pneg %p1034_p10 }
 0x24e   : > { %1386 = dma.done.wait (%p1035_p12), %s780_s13, 16  }
 0x24f   : > { %1388 = vsyncadd (%p1035_p12), %s780_s13, 4294967280  ;;  %s789_s8 = scalar_lea.sflag [#allocation17], %s779_s4 }
 0x250   : > { %1390 = dma.done.wait (%p1035_p12), %s789_s8, 16  }
 0x251   : > { %1392 = vsyncadd (%p1035_p12), %s789_s8, 4294967280  ;;  %s32_s29 = sadd.s32 1, %s1415_s29   ;;  %s1759_s17 = sld [smem:[#allocation25_spill]] }
 0x252   : > { %p29_p13 = scmp.ge.s32.totalorder %s32_s29, 4   ;;  %s1760_s26 = sld [smem:[#allocation28_spill]] }
 0x253   : > { %s1761_s27 = sld [smem:[#allocation26_spill]]  ;;  %s1763_s24 = smov %s1399_s25 }
 0x254   : > { %s1762_s28 = sld [smem:[#allocation27_spill]]  ;;  %31 = sbr.rel (!%p29_p13) target bundleno = 17 (0x11), region = 151 }
 0x257   : > { %s1764_s25 = smov %s1759_s17 }
 0x259   :  { %794 = vsyncpa [#allocation5], 1 }
 0x25a   :  { %796 = vsyncpa [#allocation5 + $0x1], 1 }
 0x25b   :  { %797 = vsyncpa [#allocation8], 1 }
 0x25c   :  { %799 = vsyncpa [#allocation8 + $0x1], 1 }
 0x25d   :  { %800 = vsyncpa [#allocation11], 1 }
 0x25e   :  { %801 = vsyncpa [#allocation14], 1 }
 0x25f   :  { %802 = vsyncpa [#allocation6], 1 }
 0x260   :  { %804 = vsyncpa [#allocation6 + $0x1], 1 }
 0x261   :  { %805 = vsyncpa [#allocation17], 1 }
 0x262   :  { %807 = vsyncpa [#allocation17 + $0x1], 1 }

</bundles_post_ra>
